<compile_context>
chip_gen: v7x
topology: tpu7x:2x2x1
jax: 0.10.0
libtpu: 0.0.40
codegen_flags: <defaults>
</compile_context>

<pallas_src>
import jax
import jax.numpy as jnp
from jax.experimental import pallas as pl
from jax.experimental.pallas import tpu as pltpu


_COLS = 1024          # lane-dense last dim (multiple of 128)
_MAX_TILE_ROWS = 512  # 512 x 1024 f32 = 2 MiB per tile


def _linreg_kernel(w_ref, b_ref, x_ref, o_ref):
    # y = w * x + b — pure VPU elementwise; scalars come from SMEM.
    w = w_ref[0, 0].astype(x_ref.dtype)
    b = b_ref[0, 0].astype(x_ref.dtype)
    o_ref[...] = (w * x_ref[...] + b).astype(o_ref.dtype)


def linear_regression_forward(x: jnp.ndarray,
                              weight: jnp.ndarray,
                              bias: jnp.ndarray) -> jnp.ndarray:
    """Pallas equivalent of `self.weight * x + self.bias` with scalar params."""
    orig_shape = x.shape
    orig_dtype = x.dtype

    # Scalar parameters as (1,1) 32-bit values in SMEM.
    w2 = weight.reshape(1, 1).astype(jnp.float32)
    b2 = bias.reshape(1, 1).astype(jnp.float32)

    # ---- Layout plumbing (free for an elementwise op) -----------------------
    # Flatten to 1-D, pad, and view as (rows, _COLS) so the output is lane
    # dense and the row axis can be tiled / pipelined.
    n = x.size
    flat = x.reshape(-1)

    rows = pl.cdiv(n, _COLS)
    if rows <= _MAX_TILE_ROWS:
        # Small input: one tile covering the full (rows, _COLS) slab.
        tile_rows = max(rows, 1)
        rows = tile_rows
    else:
        # Large input: fixed 2 MiB tiles; pad rows so they divide evenly
        # (avoids OOB edge tiles — no runtime VMEM bounds check on TPU).
        tile_rows = _MAX_TILE_ROWS
        rows = pl.cdiv(rows, tile_rows) * tile_rows

    padded = rows * _COLS
    if padded != n:
        flat = jnp.pad(flat, (0, padded - n))
    x2d = flat.reshape(rows, _COLS)

    grid_rows = rows // tile_rows

    out2d = pl.pallas_call(
        _linreg_kernel,
        out_shape=jax.ShapeDtypeStruct((rows, _COLS), orig_dtype),
        grid=(grid_rows,),
        in_specs=[
            pl.BlockSpec(memory_space=pltpu.MemorySpace.SMEM),    # weight (1,1)
            pl.BlockSpec(memory_space=pltpu.MemorySpace.SMEM),    # bias   (1,1)
            pl.BlockSpec((tile_rows, _COLS), lambda i: (i, 0)),   # x row tile
        ],
        out_specs=pl.BlockSpec((tile_rows, _COLS), lambda i: (i, 0)),
        compiler_params=pltpu.CompilerParams(
            # Independent row tiles -> shard across both TCs on v7x.
            dimension_semantics=("parallel",),
        ),
    )(w2, b2, x2d)

    # Undo the layout plumbing.
    return out2d.reshape(-1)[:n].reshape(orig_shape)


if __name__ == "__main__":
    key = jax.random.PRNGKey(0)
    kx1, kx2, kw, kb = jax.random.split(key, 4)

    # Deterministic parameter init (mirrors torch.randn(1) for weight/bias).
    weight = jax.random.normal(kw, (1,), dtype=jnp.float32)
    bias = jax.random.normal(kb, (1,), dtype=jnp.float32)

    # Case 1: small, awkward shape — exercises flatten + pad + single-tile path.
    x_small = jax.random.normal(kx1, (7, 33), dtype=jnp.float32)
    y_small = jax.block_until_ready(linear_regression_forward(x_small, weight, bias))
    y_small_ref = weight * x_small + bias
    assert y_small.shape == x_small.shape and y_small.dtype == x_small.dtype
    assert jnp.allclose(y_small, y_small_ref, atol=1e-6, rtol=1e-6)

    # Case 2: larger slab — exercises the multi-tile, pipelined grid path.
    x_big = jax.random.normal(kx2, (600, 1024), dtype=jnp.float32)
    y_big = jax.block_until_ready(linear_regression_forward(x_big, weight, bias))
    y_big_ref = weight * x_big + bias
    assert y_big.shape == x_big.shape and y_big.dtype == x_big.dtype
    assert jnp.allclose(y_big, y_big_ref, atol=1e-6, rtol=1e-6)

    # Case 3: bf16 input — explicit dtype handling in the kernel.
    x_bf16 = x_small.astype(jnp.bfloat16)
    y_bf16 = jax.block_until_ready(linear_regression_forward(x_bf16, weight, bias))
    y_bf16_ref = (weight.astype(jnp.bfloat16) * x_bf16
                  + bias.astype(jnp.bfloat16))
    assert y_bf16.dtype == jnp.bfloat16
    assert jnp.allclose(y_bf16.astype(jnp.float32),
                        y_bf16_ref.astype(jnp.float32), atol=1e-2, rtol=1e-2)

    print("KERNEL_OK")
</pallas_src>

<mosaic_0001>
module attributes {stable_mosaic.version = 11 : i64} {
  func.func @_linreg_kernel(%arg0: i32, %arg1: memref<1x1xf32, #tpu.memory_space<smem>>, %arg2: memref<1x1xf32, #tpu.memory_space<smem>>, %arg3: memref<1x1024xf32, #tpu.memory_space<vmem>>, %arg4: memref<1x1024xf32, #tpu.memory_space<vmem>>) attributes {dimension_semantics = [#tpu.dimension_semantics<parallel>], iteration_bounds = array<i64: 1>, scalar_prefetch = 0 : i64, scratch_operands = 0 : i64, tpu.core_type = #tpu.core_type<tc>, window_params = [{transform_indices = @transform_0, window_bounds = array<i64: 1, 1>}, {transform_indices = @transform_1, window_bounds = array<i64: 1, 1>}, {transform_indices = @transform_2, window_bounds = array<i64: 1, 1024>}, {transform_indices = @transform_3, window_bounds = array<i64: 1, 1024>}]} {
    %c0 = arith.constant 0 : index
    %c0_0 = arith.constant 0 : index
    %0 = memref.load %arg1[%c0, %c0_0] : memref<1x1xf32, #tpu.memory_space<smem>>
    %c0_1 = arith.constant 0 : index
    %c0_2 = arith.constant 0 : index
    %1 = memref.load %arg2[%c0_1, %c0_2] : memref<1x1xf32, #tpu.memory_space<smem>>
    %c0_3 = arith.constant 0 : index
    %c0_4 = arith.constant 0 : index
    %2 = vector.load %arg3[%c0_3, %c0_4] : memref<1x1024xf32, #tpu.memory_space<vmem>>, vector<1x1024xf32>
    %3 = vector.broadcast %0 : f32 to vector<1x1024xf32>
    %4 = arith.mulf %3, %2 : vector<1x1024xf32>
    %5 = vector.broadcast %1 : f32 to vector<1x1024xf32>
    %6 = arith.addf %4, %5 : vector<1x1024xf32>
    %c0_5 = arith.constant 0 : index
    %c0_6 = arith.constant 0 : index
    %7 = vector.load %arg4[%c0_5, %c0_6] : memref<1x1024xf32, #tpu.memory_space<vmem>>, vector<1x1024xf32>
    tpu.vector_store %arg4[%c0_5, %c0_6], %6 {strides = array<i32>} : memref<1x1024xf32, #tpu.memory_space<vmem>>, vector<1x1024xf32>,
    return
  }
  func.func @transform_0(%arg0: i32) -> (i32, i32) {
    %c0_i32 = arith.constant 0 : i32
    %c0_i32_0 = arith.constant 0 : i32
    %c0_i32_1 = arith.constant 0 : i32
    return %c0_i32, %c0_i32_0 : i32, i32
  }
  func.func @transform_1(%arg0: i32) -> (i32, i32) {
    %c0_i32 = arith.constant 0 : i32
    %c0_i32_0 = arith.constant 0 : i32
    %c0_i32_1 = arith.constant 0 : i32
    return %c0_i32, %c0_i32_0 : i32, i32
  }
  func.func @transform_2(%arg0: i32) -> (i32, i32) {
    %c0_i32 = arith.constant 0 : i32
    %c0_i32_0 = arith.constant 0 : i32
    return %arg0, %c0_i32 : i32, i32
  }
  func.func @transform_3(%arg0: i32) -> (i32, i32) {
    %c0_i32 = arith.constant 0 : i32
    %c0_i32_0 = arith.constant 0 : i32
    return %arg0, %c0_i32 : i32, i32
  }
}

</mosaic_0001>

<bundles_post_ra>
// kernel: tpu_custom_call.1
= control target key start
LH: loop header
LB: loop body
LE: loop exit
PB: predicated region body
PF: predicated region fallthrough
CT: control target
= control target key end

     0   :  { %10 = vsyncpa [#allocation5], 0  ;;  %s154_s0 = inlined_call_operand.<no memory space> [shape: f32[1,1], index: 0, kind: input, shape index: {}]   ;;  %s155_s1 = inlined_call_operand.<no memory space> [shape: f32[1,1], index: 1, kind: input, shape index: {}]   ;;  %s156_s2 = inlined_call_operand.hbm [shape: f32[1,1024], index: 2, kind: input, shape index: {}]   ;;  %s157_s3 = inlined_call_operand.hbm [shape: f32[1,1024], index: 3, kind: output, shape index: {}]  }
   0x1   :  { %11 = vsyncpa [#allocation6], 0  ;;  %s102_s12 = smov [#allocation4]   ;;  %s54_s16 = scalar_lea.hbm %s156_s2, 128 }
   0x2   :  { %s22_s13 = sshll.u32 %s102_s12, 4  ;;  %p55_p0 = scmp.ne.s32.totalorder %s156_s2, %s54_s16  ;;  %s23_s13 = int_to_ptr.vmem [resolvable:$true] %s22_s13 }
   0x3   :  { %p58_p1 = scmp.lt.u32.totalorder %s54_s16, %s156_s2 }
   0x5   :  { %p60_p2 = pnand %p58_p1, %p55_p0 }
   0x7   :  { %63 = shalt.err (!%p60_p2)
}
   0x8   :  { %s64_s21 = scalar_lea.vmem %s23_s13, 128  ;;  %p69_p4 = scmp.lt.s32.totalorder %s23_s13, %s23_s13 }
   0x9   :  { %p65_p3 = scmp.ne.s32.totalorder %s23_s13, %s64_s21  ;;  %p70_p5 = scmp.lt.s32.totalorder %s64_s21, %s64_s21 }
   0xb   :  { %p71_p6 = por %p70_p5, %p69_p4 }
   0xd   :  { %p72_p7 = pnand %p71_p6, %p65_p3 }
   0xf   :  { %75 = shalt.err (!%p72_p7)
}
  0x10   :  { %25 = dma.hbm_to_vmem [thread:$0]  %s156_s2, 128, %s23_s13, [#allocation5]  }
  0x11   :  { %98 = dma.done.wait [#allocation5], 128  }
  0x12   :  { %99 = vsyncadd [#allocation5], 4294967168  ;;  %v32_v0 = vstv %s154_s0  ;;  %v31_v1 = vld [vmem:[#allocation4] sm:$0xff]  ;;  %v34_v2 = vstv %s155_s1  ;;  %s103_s28 = smov [#allocation7]  }
  0x13   :  { %s43_s29 = sshll.u32 %s103_s28, 4  ;;  %v33_v3 = vmul.f32 %v32_v0, %v31_v1  ;;  %s44_s29 = int_to_ptr.vmem [resolvable:$true] %s43_s29 }
  0x14   :  { %s76_s30 = scalar_lea.vmem %s44_s29, 128  ;;  %p81_p9 = scmp.lt.s32.totalorder %s44_s29, %s44_s29 }
  0x15   :  { %v35_v4 = vadd.f32 %v34_v2, %v33_v3  ;;  %p77_p8 = scmp.ne.s32.totalorder %s44_s29, %s76_s30  ;;  %p82_p10 = scmp.lt.s32.totalorder %s76_s30, %s76_s30 }
  0x17   :  { %36 = vst [vmem:[#allocation7] sm:$0xff] %v35_v4  ;;  %p83_p11 = por %p82_p10, %p81_p9 }
  0x19   :  { %p84_p12 = pnand %p83_p11, %p77_p8 }
  0x1b   :  { %87 = shalt.err (!%p84_p12)
}
  0x1c   :  { %s88_s4 = scalar_lea.hbm %s157_s3, 128 }
  0x1d   :  { %p89_p13 = scmp.ne.s32.totalorder %s157_s3, %s88_s4  ;;  %p92_p0 = scmp.lt.u32.totalorder %s88_s4, %s157_s3 }
  0x1f   :  { %p94_p1 = pnand %p92_p0, %p89_p13 }
  0x21   :  { %97 = shalt.err (!%p94_p1)
}
  0x22   :  { %46 = dma.vmem_to_hbm [thread:$0]  %s44_s29, 128, %s157_s3, [#allocation6]  }
  0x23   :  { %100 = dma.done.wait [#allocation6], 128  }
  0x24   :  { %101 = vsyncadd [#allocation6], 4294967168 }
  0x25   :  { %50 = vsyncpa [#allocation5], 1 }
  0x26   :  { %51 = vsyncpa [#allocation6], 1 }

</bundles_post_ra>
